<compile_context>
chip_gen: v7x
topology: tpu7x:2x2x1
jax: 0.10.0
libtpu: 0.0.40
codegen_flags: <defaults>
</compile_context>

<pallas_src>
import functools

import jax
import jax.numpy as jnp
from jax import lax
from jax.experimental import pallas as pl
from jax.experimental.pallas import tpu as pltpu


def _round_up(n, m):
    return ((n + m - 1) // m) * m


def _cdiv(a, b):
    return -(-a // b)


def _qnet_kernel(x_ref, w1_ref, b1_ref, wva1_ref, bva1_ref, w2_ref, b2_ref,
                 out_ref, psum_ref, *, true_b, tb, a_lane):
    # hidden = relu(x @ W1 + b1)   (MXU in compute dtype, bias/ReLU in f32)
    h = jnp.dot(x_ref[...], w1_ref[...], preferred_element_type=jnp.float32)
    h = jnp.maximum(h + b1_ref[...], 0.0).astype(w1_ref.dtype)

    # fused value|advantage first linear: relu(h @ [Wv1|Wa1] + [bv1|ba1])
    va = jnp.dot(h, wva1_ref[...], preferred_element_type=jnp.float32)
    va = jnp.maximum(va + bva1_ref[...], 0.0).astype(wva1_ref.dtype)

    # fused second linears -> lane-dense (TB, OUT) slab in f32
    slab = jnp.dot(va, w2_ref[...], preferred_element_type=jnp.float32)
    slab = slab + b2_ref[...]

    # q slab emitted in compute dtype (halves the dominant HBM write on bf16 path)
    out_ref[...] = slab.astype(out_ref.dtype)

    # f32 per-tile partial sum of lane A (= sum_j a_j per row).  Padded batch
    # rows produce nonzero relu(b1)-driven values, so mask rows >= true_b here.
    rows = pl.program_id(0) * tb + lax.broadcasted_iota(jnp.int32, (tb, 1), 0)
    a_rows = jnp.where(rows < true_b, slab[:, a_lane:a_lane + 1], 0.0)
    psum_ref[...] = jnp.broadcast_to(jnp.sum(a_rows), (8, 128)).astype(jnp.float32)


def qnetwork_forward(x, params, *, block_b=1024, compute_dtype=jnp.bfloat16):
    """x: (B, state_size) f32. params: dict of weights/biases (see init_params)."""
    x = jnp.asarray(x, jnp.float32)
    B, S = x.shape
    H = params["w1"].shape[1]
    A = params["wa2"].shape[1]
    OUT = max(128, _round_up(A + 1, 128))          # lane-dense output slab width

    # ---- one-time weight fusion (wrapper-side layout plumbing, not compute) ----
    w1 = params["w1"]
    b1 = params["b1"].astype(jnp.float32)

    w_va1 = jnp.concatenate([params["wv1"], params["wa1"]], axis=1)   # (H, 2H)
    b_va1 = jnp.concatenate([params["bv1"], params["ba1"]],
                            axis=1).astype(jnp.float32)               # (1, 2H)

    wv2, bv2 = params["wv2"], params["bv2"]                           # (H,1), (1,1)
    wa2, ba2 = params["wa2"], params["ba2"]                           # (H,A), (1,A)
    w2 = jnp.zeros((2 * H, OUT), jnp.float32)
    w2 = w2.at[:H, :A].set(jnp.broadcast_to(wv2, (H, A)))             # value into every q lane
    w2 = w2.at[H:, :A].set(wa2)                                       # advantage lanes
    w2 = w2.at[H:, A].set(jnp.sum(wa2, axis=1))                       # per-row sum_j a_j
    b2 = jnp.zeros((1, OUT), jnp.float32)
    b2 = b2.at[0, :A].set(bv2[0, 0] + ba2[0, :])
    b2 = b2.at[0, A].set(jnp.sum(ba2))

    # ---- MXU input dtype (bf16 default on all generations) ----
    cd = jnp.dtype(compute_dtype)
    slab_dt = cd                                   # q slab emitted in compute dtype
    x_c = x.astype(cd)
    w1_c, w_va1_c, w2_c = w1.astype(cd), w_va1.astype(cd), w2.astype(cd)

    # ---- batch tiling: >=2 tiles when B allows (v7x megacore + pipeline),
    #      TB ~ ceil(B / n_tiles) rounded to 8 -> at most one partial tile of waste
    n_tiles = max(1, _cdiv(B, block_b))
    if B >= 16:
        n_tiles = max(2, n_tiles)
    TB = _round_up(_cdiv(B, n_tiles), 8)
    B_pad = _round_up(B, TB)
    grid_n = B_pad // TB
    if B_pad != B:
        x_c = jnp.pad(x_c, ((0, B_pad - B), (0, 0)))

    # ---- VMEM budget (weights single-buffered, x / outputs double-buffered) ----
    itemsize = cd.itemsize
    weight_bytes = (w1_c.size + w_va1_c.size + w2_c.size) * itemsize
    bias_bytes = (b1.size + b_va1.size + b2.size) * 4
    stream_bytes = 2 * (TB * S * itemsize + TB * OUT * slab_dt.itemsize + 8 * 128 * 4)
    live_bytes = TB * 3 * H * (4 + itemsize) + TB * OUT * 4
    vmem_budget = weight_bytes + bias_bytes + stream_bytes + live_bytes + (4 << 20)
    vmem_limit = int(min(max(vmem_budget, 32 << 20), 100 << 20))

    flops = 2 * B_pad * (S * H + H * 2 * H + 2 * H * OUT)
    bytes_accessed = (B_pad * S * itemsize
                      + weight_bytes + bias_bytes
                      + B_pad * OUT * slab_dt.itemsize
                      + grid_n * 8 * 128 * 4)

    resident = functools.partial(pl.BlockSpec, pipeline_mode=pl.Buffered(1))

    kernel = functools.partial(_qnet_kernel, true_b=B, tb=TB, a_lane=A)

    slab, psums = pl.pallas_call(
        kernel,
        out_shape=(jax.ShapeDtypeStruct((B_pad, OUT), slab_dt),
                   jax.ShapeDtypeStruct((grid_n * 8, 128), jnp.float32)),
        grid_spec=pltpu.PrefetchScalarGridSpec(
            num_scalar_prefetch=0,
            grid=(grid_n,),
            in_specs=[
                pl.BlockSpec((TB, S), lambda i: (i, 0)),          # x: streamed per batch tile
                resident((S, H), lambda i: (0, 0)),               # W1: resident, single-buffered
                resident((1, H), lambda i: (0, 0)),
                resident((H, 2 * H), lambda i: (0, 0)),           # [Wv1|Wa1]: resident
                resident((1, 2 * H), lambda i: (0, 0)),
                resident((2 * H, OUT), lambda i: (0, 0)),         # fused block W2: resident
                resident((1, OUT), lambda i: (0, 0)),
            ],
            out_specs=(
                pl.BlockSpec((TB, OUT), lambda i: (i, 0)),        # q slab (compute dtype)
                pl.BlockSpec((8, 128), lambda i: (i, 0)),         # f32 per-tile sum_j a_j
            ),
        ),
        compiler_params=pltpu.CompilerParams(
            dimension_semantics=("parallel",),      # batch tiles independent -> megacore
            vmem_limit_bytes=vmem_limit,
        ),
        cost_estimate=pl.CostEstimate(
            flops=flops, transcendentals=0, bytes_accessed=bytes_accessed),
    )(x_c, w1_c, b1, w_va1_c, b_va1, w2_c, b2)

    # Epilogue in JAX: the global scalar mean over ALL of `a` couples every batch
    # row, so it is finalized here from the f32 per-tile partial sums (padded rows
    # already masked in-kernel).
    q = slab[:B, :A].astype(jnp.float32)            # lanes [0,A): v + a_j
    mean_a = jnp.sum(psums[0::8, 0]) / (B * A)      # f32 mean path, per-tile sums
    return q - mean_a


def init_params(key, state_size, action_size, hidden_dim=256):
    """PyTorch nn.Linear default init (U[-1/sqrt(fan_in), +]); weights stored (in, out)."""
    def linear(key, fan_in, fan_out):
        kw, kb = jax.random.split(key)
        bound = 1.0 / jnp.sqrt(float(fan_in))
        w = jax.random.uniform(kw, (fan_in, fan_out), jnp.float32, -bound, bound)
        b = jax.random.uniform(kb, (1, fan_out), jnp.float32, -bound, bound)
        return w, b

    k1, k2, k3, k4, k5 = jax.random.split(key, 5)
    w1, b1 = linear(k1, state_size, hidden_dim)
    wv1, bv1 = linear(k2, hidden_dim, hidden_dim)
    wv2, bv2 = linear(k3, hidden_dim, 1)
    wa1, ba1 = linear(k4, hidden_dim, hidden_dim)
    wa2, ba2 = linear(k5, hidden_dim, action_size)
    return dict(w1=w1, b1=b1, wv1=wv1, bv1=bv1, wv2=wv2, bv2=bv2,
                wa1=wa1, ba1=ba1, wa2=wa2, ba2=ba2)


def qnetwork_ref(x, p):
    """Pure-JAX reference (matches the PyTorch forward exactly)."""
    h = jnp.maximum(x @ p["w1"] + p["b1"], 0.0)
    v = jnp.maximum(h @ p["wv1"] + p["bv1"], 0.0) @ p["wv2"] + p["bv2"]
    a = jnp.maximum(h @ p["wa1"] + p["ba1"], 0.0) @ p["wa2"] + p["ba2"]
    return v + a - jnp.mean(a)      # global scalar mean, as in torch .mean()


if __name__ == "__main__":
    state_size = 16
    hidden_dim = 32
    action_size = 4

    key = jax.random.PRNGKey(0)
    kx, kp = jax.random.split(key)
    params = init_params(kp, state_size, action_size, hidden_dim)

    # --- small batch (single grid step) ---
    batch = 8
    x = jax.random.normal(kx, (batch, state_size), jnp.float32)
    ref = qnetwork_ref(x, params)

    # f32 MXU path: tight check against the reference.
    out_f32 = jax.block_until_ready(
        qnetwork_forward(x, params, compute_dtype=jnp.float32))
    assert out_f32.shape == (batch, action_size)
    assert jnp.allclose(out_f32, ref, atol=1e-4, rtol=1e-4), "f32 mismatch vs reference"

    # Default path (bf16 MXU, bf16 q slab, f32 mean): looser tolerance.
    out_bf16 = jax.block_until_ready(qnetwork_forward(x, params))
    assert out_bf16.shape == (batch, action_size)
    assert jnp.allclose(out_bf16, ref, atol=1e-1, rtol=1e-1), "bf16 mismatch vs reference"

    # --- batch that exercises multi-tile grid + padded-row masking (B=20 -> grid=2) ---
    batch2 = 20
    x2 = jax.random.normal(jax.random.fold_in(kx, 1), (batch2, state_size), jnp.float32)
    ref2 = qnetwork_ref(x2, params)

    out2_f32 = jax.block_until_ready(
        qnetwork_forward(x2, params, compute_dtype=jnp.float32))
    assert out2_f32.shape == (batch2, action_size)
    assert jnp.allclose(out2_f32, ref2, atol=1e-4, rtol=1e-4), "f32 multi-tile mismatch"

    out2_bf16 = jax.block_until_ready(qnetwork_forward(x2, params))
    assert out2_bf16.shape == (batch2, action_size)
    assert jnp.allclose(out2_bf16, ref2, atol=1e-1, rtol=1e-1), "bf16 multi-tile mismatch"

    print("KERNEL_OK")
</pallas_src>

<mosaic_0001>
module attributes {stable_mosaic.version = 11 : i64} {
  func.func @_qnet_kernel(%arg0: i32, %arg1: memref<8x16xf32, #tpu.memory_space<vmem>>, %arg2: memref<16x32xf32, #tpu.memory_space<vmem>>, %arg3: memref<1x32xf32, #tpu.memory_space<vmem>>, %arg4: memref<32x64xf32, #tpu.memory_space<vmem>>, %arg5: memref<1x64xf32, #tpu.memory_space<vmem>>, %arg6: memref<64x128xf32, #tpu.memory_space<vmem>>, %arg7: memref<1x128xf32, #tpu.memory_space<vmem>>, %arg8: memref<8x128xf32, #tpu.memory_space<vmem>>, %arg9: memref<8x128xf32, #tpu.memory_space<vmem>>) attributes {dimension_semantics = [#tpu.dimension_semantics<parallel>], iteration_bounds = array<i64: 1>, scalar_prefetch = 0 : i64, scratch_operands = 0 : i64, tpu.core_type = #tpu.core_type<tc>, window_params = [{transform_indices = @transform_0, window_bounds = array<i64: 8, 16>}, {pipeline_mode = #tpu.pipeline_mode<synchronous>, transform_indices = @transform_1, window_bounds = array<i64: 16, 32>}, {pipeline_mode = #tpu.pipeline_mode<synchronous>, transform_indices = @transform_2, window_bounds = array<i64: 1, 32>}, {pipeline_mode = #tpu.pipeline_mode<synchronous>, transform_indices = @transform_3, window_bounds = array<i64: 32, 64>}, {pipeline_mode = #tpu.pipeline_mode<synchronous>, transform_indices = @transform_4, window_bounds = array<i64: 1, 64>}, {pipeline_mode = #tpu.pipeline_mode<synchronous>, transform_indices = @transform_5, window_bounds = array<i64: 64, 128>}, {pipeline_mode = #tpu.pipeline_mode<synchronous>, transform_indices = @transform_6, window_bounds = array<i64: 1, 128>}, {transform_indices = @transform_7, window_bounds = array<i64: 8, 128>}, {transform_indices = @transform_8, window_bounds = array<i64: 8, 128>}]} {
    %c0 = arith.constant 0 : index
    %c0_0 = arith.constant 0 : index
    %0 = vector.load %arg1[%c0, %c0_0] : memref<8x16xf32, #tpu.memory_space<vmem>>, vector<8x16xf32>
    %c0_1 = arith.constant 0 : index
    %c0_2 = arith.constant 0 : index
    %1 = vector.load %arg2[%c0_1, %c0_2] : memref<16x32xf32, #tpu.memory_space<vmem>>, vector<16x32xf32>
    %cst = arith.constant dense<0.000000e+00> : vector<8x32xf32>
    %2 = tpu.matmul %0, %1, %cst {dimension_numbers = #tpu.dot_dimension_numbers<[1], [0], [0], [1], [0, 0, 1, 1], [], []>} : vector<8x16xf32>, vector<16x32xf32>, vector<8x32xf32> -> vector<8x32xf32>
    %c0_3 = arith.constant 0 : index
    %c0_4 = arith.constant 0 : index
    %3 = vector.load %arg3[%c0_3, %c0_4] : memref<1x32xf32, #tpu.memory_space<vmem>>, vector<1x32xf32>
    %4 = vector.broadcast %3 : vector<1x32xf32> to vector<8x32xf32>
    %5 = arith.addf %2, %4 : vector<8x32xf32>
    %cst_5 = arith.constant 0.000000e+00 : f32
    %6 = vector.broadcast %cst_5 : f32 to vector<8x32xf32>
    %7 = arith.maximumf %5, %6 : vector<8x32xf32>
    %c0_6 = arith.constant 0 : index
    %c0_7 = arith.constant 0 : index
    %8 = vector.load %arg4[%c0_6, %c0_7] : memref<32x64xf32, #tpu.memory_space<vmem>>, vector<32x64xf32>
    %cst_8 = arith.constant dense<0.000000e+00> : vector<8x64xf32>
    %9 = tpu.matmul %7, %8, %cst_8 {dimension_numbers = #tpu.dot_dimension_numbers<[1], [0], [0], [1], [0, 0, 1, 1], [], []>} : vector<8x32xf32>, vector<32x64xf32>, vector<8x64xf32> -> vector<8x64xf32>
    %c0_9 = arith.constant 0 : index
    %c0_10 = arith.constant 0 : index
    %10 = vector.load %arg5[%c0_9, %c0_10] : memref<1x64xf32, #tpu.memory_space<vmem>>, vector<1x64xf32>
    %11 = vector.broadcast %10 : vector<1x64xf32> to vector<8x64xf32>
    %12 = arith.addf %9, %11 : vector<8x64xf32>
    %cst_11 = arith.constant 0.000000e+00 : f32
    %13 = vector.broadcast %cst_11 : f32 to vector<8x64xf32>
    %14 = arith.maximumf %12, %13 : vector<8x64xf32>
    %c0_12 = arith.constant 0 : index
    %c0_13 = arith.constant 0 : index
    %15 = vector.load %arg6[%c0_12, %c0_13] : memref<64x128xf32, #tpu.memory_space<vmem>>, vector<64x128xf32>
    %cst_14 = arith.constant dense<0.000000e+00> : vector<8x128xf32>
    %16 = tpu.matmul %14, %15, %cst_14 {dimension_numbers = #tpu.dot_dimension_numbers<[1], [0], [0], [1], [0, 0, 1, 1], [], []>} : vector<8x64xf32>, vector<64x128xf32>, vector<8x128xf32> -> vector<8x128xf32>
    %c0_15 = arith.constant 0 : index
    %c0_16 = arith.constant 0 : index
    %17 = vector.load %arg7[%c0_15, %c0_16] : memref<1x128xf32, #tpu.memory_space<vmem>>, vector<1x128xf32>
    %18 = vector.broadcast %17 : vector<1x128xf32> to vector<8x128xf32>
    %19 = arith.addf %16, %18 : vector<8x128xf32>
    %c0_17 = arith.constant 0 : index
    %c0_18 = arith.constant 0 : index
    %20 = vector.load %arg8[%c0_17, %c0_18] : memref<8x128xf32, #tpu.memory_space<vmem>>, vector<8x128xf32>
    tpu.vector_store %arg8[%c0_17, %c0_18], %19 {strides = array<i32>} : memref<8x128xf32, #tpu.memory_space<vmem>>, vector<8x128xf32>,
    %c8_i32 = arith.constant 8 : i32
    %21 = arith.muli %arg0, %c8_i32 : i32
    %22 = tpu.iota {dimensions = array<i32: 0>} : vector<8x1xi32>
    %23 = vector.broadcast %21 : i32 to vector<8x1xi32>
    %24 = arith.addi %23, %22 : vector<8x1xi32>
    %c8_i32_19 = arith.constant 8 : i32
    %25 = vector.broadcast %c8_i32_19 : i32 to vector<8x1xi32>
    %26 = arith.cmpi slt, %24, %25 : vector<8x1xi32>
    %27 = vector.extract_strided_slice %19 {offsets = [0, 4], sizes = [8, 1], strides = [1, 1]} : vector<8x128xf32> to vector<8x1xf32>
    %cst_20 = arith.constant 0.000000e+00 : f32
    %28 = vector.broadcast %cst_20 : f32 to vector<8x1xf32>
    %29 = arith.select %26, %27, %28 : vector<8x1xi1>, vector<8x1xf32>
    %30 = vector.shape_cast %29 : vector<8x1xf32> to vector<1x8x1xf32>
    %cst_21 = arith.constant dense<0.000000e+00> : vector<1xf32>
    %31 = vector.multi_reduction <add>, %30, %cst_21 [1, 2] : vector<1x8x1xf32> to vector<1xf32>
    %32 = vector.shape_cast %31 : vector<1xf32> to vector<1x1x1xf32>
    %33 = vector.extract %32[0, 0, 0] : f32 from vector<1x1x1xf32>
    %34 = vector.broadcast %33 : f32 to vector<8x128xf32>
    %c0_22 = arith.constant 0 : index
    %c0_23 = arith.constant 0 : index
    %35 = vector.load %arg9[%c0_22, %c0_23] : memref<8x128xf32, #tpu.memory_space<vmem>>, vector<8x128xf32>
    tpu.vector_store %arg9[%c0_22, %c0_23], %34 {strides = array<i32>} : memref<8x128xf32, #tpu.memory_space<vmem>>, vector<8x128xf32>,
    return
  }
  func.func @transform_0(%arg0: i32) -> (i32, i32) {
    %c0_i32 = arith.constant 0 : i32
    %c0_i32_0 = arith.constant 0 : i32
    return %arg0, %c0_i32 : i32, i32
  }
  func.func @transform_1(%arg0: i32) -> (i32, i32) {
    %c0_i32 = arith.constant 0 : i32
    %c0_i32_0 = arith.constant 0 : i32
    %c0_i32_1 = arith.constant 0 : i32
    return %c0_i32, %c0_i32_0 : i32, i32
  }
  func.func @transform_2(%arg0: i32) -> (i32, i32) {
    %c0_i32 = arith.constant 0 : i32
    %c0_i32_0 = arith.constant 0 : i32
    %c0_i32_1 = arith.constant 0 : i32
    return %c0_i32, %c0_i32_0 : i32, i32
  }
  func.func @transform_3(%arg0: i32) -> (i32, i32) {
    %c0_i32 = arith.constant 0 : i32
    %c0_i32_0 = arith.constant 0 : i32
    %c0_i32_1 = arith.constant 0 : i32
    return %c0_i32, %c0_i32_0 : i32, i32
  }
  func.func @transform_4(%arg0: i32) -> (i32, i32) {
    %c0_i32 = arith.constant 0 : i32
    %c0_i32_0 = arith.constant 0 : i32
    %c0_i32_1 = arith.constant 0 : i32
    return %c0_i32, %c0_i32_0 : i32, i32
  }
  func.func @transform_5(%arg0: i32) -> (i32, i32) {
    %c0_i32 = arith.constant 0 : i32
    %c0_i32_0 = arith.constant 0 : i32
    %c0_i32_1 = arith.constant 0 : i32
    return %c0_i32, %c0_i32_0 : i32, i32
  }
  func.func @transform_6(%arg0: i32) -> (i32, i32) {
    %c0_i32 = arith.constant 0 : i32
    %c0_i32_0 = arith.constant 0 : i32
    %c0_i32_1 = arith.constant 0 : i32
    return %c0_i32, %c0_i32_0 : i32, i32
  }
  func.func @transform_7(%arg0: i32) -> (i32, i32) {
    %c0_i32 = arith.constant 0 : i32
    %c0_i32_0 = arith.constant 0 : i32
    return %arg0, %c0_i32 : i32, i32
  }
  func.func @transform_8(%arg0: i32) -> (i32, i32) {
    %c0_i32 = arith.constant 0 : i32
    %c0_i32_0 = arith.constant 0 : i32
    return %arg0, %c0_i32 : i32, i32
  }
}

</mosaic_0001>

<bundles_post_ra>
// kernel: tpu_custom_call.1
= control target key start
LH: loop header
LB: loop body
LE: loop exit
PB: predicated region body
PF: predicated region fallthrough
CT: control target
= control target key end

     0   :  { %14 = vsyncpa [#allocation3], 0  ;;  %s786_s0 = inlined_call_operand.hbm [shape: f32[8,16], index: 0, kind: input, shape index: {}]   ;;  %s787_s1 = inlined_call_operand.hbm [shape: f32[16,32], index: 1, kind: input, shape index: {}]   ;;  %s788_s2 = inlined_call_operand.vmem [shape: f32[1,32], index: 2, kind: input, shape index: {}]   ;;  %s789_s3 = inlined_call_operand.hbm [shape: f32[32,64], index: 3, kind: input, shape index: {}]   ;;  %s790_s4 = inlined_call_operand.vmem [shape: f32[1,64], index: 4, kind: input, shape index: {}]   ;;  %s791_s5 = inlined_call_operand.hbm [shape: f32[64,128], index: 5, kind: input, shape index: {}]   ;;  %s792_s6 = inlined_call_operand.vmem [shape: f32[1,128], index: 6, kind: input, shape index: {}]   ;;  %s793_s7 = inlined_call_operand.hbm [shape: f32[8,128], index: 7, kind: output, shape index: {0}]   ;;  %s794_s8 = inlined_call_operand.hbm [shape: f32[8,128], index: 8, kind: output, shape index: {1}]  }
   0x1   :  { %15 = vsyncpa [#allocation6], 0 }
   0x2   :  { %16 = vsyncpa [#allocation9], 0 }
   0x3   :  { %17 = vsyncpa [#allocation4], 0 }
   0x4   :  { %18 = vsyncpa [#allocation12], 0  ;;  %s636_s27 = smov [#allocation5]   ;;  %s494_s9 = scalar_lea.hbm %s787_s1, 256 }
   0x5   :  { %s34_s28 = sshll.u32 %s636_s27, 4  ;;  %p495_p0 = scmp.ne.s32.totalorder %s787_s1, %s494_s9  ;;  %s35_s28 = int_to_ptr.vmem [resolvable:$true] %s34_s28 }
   0x6   :  { %p498_p1 = scmp.lt.u32.totalorder %s494_s9, %s787_s1 }
   0x8   :  { %p500_p2 = pnand %p498_p1, %p495_p0 }
   0xa   :  { %503 = shalt.err (!%p500_p2)
}
   0xb   :  { %s504_s14 = scalar_lea.vmem %s35_s28, 256  ;;  %p509_p4 = scmp.lt.s32.totalorder %s35_s28, %s35_s28 }
   0xc   :  { %p505_p3 = scmp.ne.s32.totalorder %s35_s28, %s504_s14  ;;  %p510_p5 = scmp.lt.s32.totalorder %s504_s14, %s504_s14 }
   0xe   :  { %p511_p6 = por %p510_p5, %p509_p4 }
  0x10   :  { %p512_p7 = pnand %p511_p6, %p505_p3 }
  0x12   :  { %515 = shalt.err (!%p512_p7)
}
  0x13   :  { %s637_s15 = smov 128   ;;  %s638_s16 = smov 8  }
  0x14   :  { %40 = dma.hbm_to_vmem [thread:$0]  %s787_s1, 256, %s35_s28, [#allocation6], %s637_s15, %s637_s15, %s638_s16  }
  0x15   :  { %s639_s19 = smov [#allocation2]   ;;  %s640_s21 = smov [#allocation7]  }
  0x16   :  { %s25_s20 = sshll.u32 %s639_s19, 4  ;;  %s48_s22 = sshll.u32 %s640_s21, 4  ;;  %s26_s20 = int_to_ptr.vmem [resolvable:$true] %s25_s20  ;;  %s49_s22 = int_to_ptr.vmem [resolvable:$true] %s48_s22 }
  0x17   :  { %s516_s25 = scalar_lea.hbm %s786_s0, 128 }
  0x18   :  { %p517_p8 = scmp.ne.s32.totalorder %s786_s0, %s516_s25  ;;  %p520_p9 = scmp.lt.u32.totalorder %s516_s25, %s786_s0 }
  0x1a   :  { %p522_p10 = pnand %p520_p9, %p517_p8 }
  0x1c   :  { %525 = shalt.err (!%p522_p10)
}
  0x1d   :  { %s526_s1 = scalar_lea.vmem %s26_s20, 128  ;;  %p531_p12 = scmp.lt.s32.totalorder %s26_s20, %s26_s20 }
  0x1e   :  { %p527_p11 = scmp.ne.s32.totalorder %s26_s20, %s526_s1  ;;  %p532_p13 = scmp.lt.s32.totalorder %s526_s1, %s526_s1 }
  0x20   :  { %p533_p0 = por %p532_p13, %p531_p12 }
  0x22   :  { %p534_p1 = pnand %p533_p0, %p527_p11 }
  0x24   :  { %537 = shalt.err (!%p534_p1)
}
  0x25   :  { %28 = dma.hbm_to_vmem [thread:$0]  %s786_s0, 128, %s26_s20, [#allocation3]  }
  0x26   :  { %s538_s12 = scalar_lea.hbm %s789_s3, 512 }
  0x27   :  { %p539_p2 = scmp.ne.s32.totalorder %s789_s3, %s538_s12  ;;  %p542_p3 = scmp.lt.u32.totalorder %s538_s12, %s789_s3 }
  0x29   :  { %p544_p4 = pnand %p542_p3, %p539_p2 }
  0x2b   :  { %547 = shalt.err (!%p544_p4)
}
  0x2c   :  { %s548_s19 = scalar_lea.vmem %s49_s22, 512  ;;  %p553_p6 = scmp.lt.s32.totalorder %s49_s22, %s49_s22 }
  0x2d   :  { %p549_p5 = scmp.ne.s32.totalorder %s49_s22, %s548_s19  ;;  %p554_p7 = scmp.lt.s32.totalorder %s548_s19, %s548_s19 }
  0x2f   :  { %p555_p8 = por %p554_p7, %p553_p6 }
  0x31   :  { %p556_p9 = pnand %p555_p8, %p549_p5 }
  0x33   :  { %559 = shalt.err (!%p556_p9)
}
  0x34   :  { %54 = dma.hbm_to_vmem [thread:$0]  %s789_s3, 512, %s49_s22, [#allocation6], %s637_s15, %s637_s15, %s638_s16  }
  0x35   :  { %s641_s21 = smov [#allocation8]   ;;  %s560_s26 = scalar_lea.hbm %s791_s5, 1024 }
  0x36   :  { %s62_s23 = sshll.u32 %s641_s21, 4  ;;  %p561_p10 = scmp.ne.s32.totalorder %s791_s5, %s560_s26  ;;  %s63_s23 = int_to_ptr.vmem [resolvable:$true] %s62_s23 }
  0x37   :  { %p564_p11 = scmp.lt.u32.totalorder %s560_s26, %s791_s5 }
  0x39   :  { %p566_p12 = pnand %p564_p11, %p561_p10 }
  0x3b   :  { %569 = shalt.err (!%p566_p12)
}
  0x3c   :  { %s570_s28 = scalar_lea.vmem %s63_s23, 1024  ;;  %p575_p0 = scmp.lt.s32.totalorder %s63_s23, %s63_s23 }
  0x3d   :  { %p571_p13 = scmp.ne.s32.totalorder %s63_s23, %s570_s28  ;;  %p576_p1 = scmp.lt.s32.totalorder %s570_s28, %s570_s28 }
  0x3f   :  { %p577_p2 = por %p576_p1, %p575_p0 }
  0x41   :  { %p578_p3 = pnand %p577_p2, %p571_p13 }
  0x43   :  { %581 = shalt.err (!%p578_p3)
}
  0x44   :  { %68 = dma.hbm_to_vmem [thread:$0]  %s791_s5, 1024, %s63_s23, [#allocation9], %s637_s15, %s637_s15, %s638_s16  }
  0x45   :  { %626 = dma.done.wait [#allocation3], 128  }
  0x46   :  { %627 = vsyncadd [#allocation3], 4294967168 }
  0x47   :  { %628 = dma.done.wait [#allocation6], 768  }
  0x48   :  { %629 = vsyncadd [#allocation6], 4294966528 }
  0x49   :  { %630 = dma.done.wait [#allocation9], 1024  }
  0x4a   :  { %631 = vsyncadd [#allocation9], 4294966272  ;;  %v642_v0 = vmov 0.0|0.0   ;;  %vm643_vm0 = vmmov 0   ;;  %v644_v1 = vmov 0.0   ;;  %v84_v2 = vld [vmem:[#allocation5] sm:$0xff] }
  0x4b   :  { %459 = vmatprep.subr.bf16.mxu1 %v642_v0  ;;  %426 = vmatprep.mubr.msk.f32.mxu1 %vm643_vm0, %v644_v1  ;;  %v85_v3 = vld [vmem:[#allocation5 + $0x8] sm:$0xff]  ;;  %v168_v5 = vld [vmem:[#allocation7] sm:$0xff]  ;;  %v169_v6 = vld [vmem:[#allocation7 + $0x8] sm:$0xff]  ;;  %vm93_vm1 = vcmask 130048   ;;  %vm179_vm2 = vcmask 261120   ;;  %vm269_vm3 = vcmask 523264  }
  0x4c   :  { %468 = vmatprep.subr.bf16.mxu0 %v642_v0  ;;  %456 = vmatprep.mubr.msk.f32.mxu0 %vm643_vm0, %v644_v1  ;;  %v460_v4 = vpack.c.bf16 %v85_v3, %v84_v2  ;;  %v83_v7 = vld [vmem:[#allocation2] sm:$0xff]  ;;  %v463_v8 = vpack.c.bf16 %v169_v6, %v168_v5  ;;  %v170_v9 = vld [vmem:[#allocation7 + $0x10] sm:$0xff]  ;;  %v171_v10 = vld [vmem:[#allocation7 + $0x18] sm:$0xff]  ;;  %s645_s11 = smov 124   ;;  %vm355_vm4 = vcmask 7168  }
  0x4d   :  { %v466_v11 = vpack.c.bf16 %v171_v10, %v170_v9  ;;  %v254_v12 = vld [vmem:[#allocation8] sm:$0xff]  ;;  %v255_v13 = vld [vmem:[#allocation8 + $0x8] sm:$0xff]  ;;  %v256_v14 = vld [vmem:[#allocation8 + $0x10] sm:$0xff] }
  0x4e   :  { %461 = vmatpush3.bf16.msra.mxu1 %v460_v4  ;;  %v469_v15 = vpack.c.bf16 %v255_v13, %v254_v12  ;;  %v257_v16 = vld [vmem:[#allocation8 + $0x18] sm:$0xff]  ;;  %v258_v18 = vld [vmem:[#allocation8 + $0x20] sm:$0xff]  ;;  %v259_v19 = vld [vmem:[#allocation8 + $0x28] sm:$0xff] }
  0x4f   :  { %462 = vmatprep.subr.bf16.mxu1 %v642_v0  ;;  %v472_v17 = vpack.c.bf16 %v257_v16, %v256_v14  ;;  %v475_v20 = vpack.c.bf16 %v259_v19, %v258_v18  ;;  %v399_v21 = vld [vmem:[%s788_s2] ss:$0 sm:$0xff]  ;;  %v260_v26 = vld [vmem:[#allocation8 + $0x30] sm:$0xff]  ;;  %v261_v27 = vld [vmem:[#allocation8 + $0x38] sm:$0xff] }
  0x50   :  { %470 = vmatpush3.bf16.msra.mxu0 %v469_v15  ;;  %v478_v28 = vpack.c.bf16 %v261_v27, %v260_v26  ;;  %v401_v29 = vld [vmem:[%s790_s4] ss:$0 sm:$0xff]  ;;  %s646_s4 = smov [#allocation10]  }
  0x51   :  { %427 = vmatmul.mubr.msk.f32.vlgmr.msra.gmra.mrb[0].mxu1 %vm93_vm1, %v83_v7  ;;  %471 = vmatprep.subr.bf16.mxu0 %v642_v0  ;;  %v403_v34 = vld [vmem:[%s792_s6] ss:$0 sm:$0xff]  ;;  %s374_s12 = sshll.u32 %s646_s4, 4  ;;  %s375_s12 = int_to_ptr.vmem [resolvable:$true] %s374_s12 }
  0x52   :  { %464 = vmatpush3.bf16.msra.mxu1 %v463_v8  ;;  %437 = vmatprep.mubr.msk.f32.mxu1 %vm643_vm0, %v644_v1  ;;  %s582_s13 = scalar_lea.vmem %s375_s12, 128  ;;  %p587_p5 = scmp.lt.s32.totalorder %s375_s12, %s375_s12 }
  0x53   :  { %465 = vmatprep.subr.bf16.mxu1 %v642_v0  ;;  %p583_p4 = scmp.ne.s32.totalorder %s375_s12, %s582_s13  ;;  %p588_p6 = scmp.lt.s32.totalorder %s582_s13, %s582_s13 }
  0x54   :  { %473 = vmatpush3.bf16.msra.mxu0 %v472_v17 }
  0x55   :  { %474 = vmatprep.subr.bf16.mxu0 %v642_v0  ;;  %p589_p7 = por %p588_p6, %p587_p5 }
  0x56   :  { %467 = vmatpush3.bf16.msra.mxu1 %v466_v11 }
  0x57   :  { %p590_p8 = pnand %p589_p7, %p583_p4 }
  0x58   :  { %476 = vmatpush3.bf16.msra.mxu0 %v475_v20 }
  0x59   :  { %477 = vmatprep.subr.bf16.mxu0 %v642_v0 }
  0x5c   :  { %479 = vmatpush3.bf16.msra.mxu0 %v478_v28 }
 0x124   :  { %v163_v22 = vpop.f32.mrb[0].mxu1 }
 0x125   :  { %v164_v23 = vadd.f32 %v399_v21, %v163_v22  ;;  %v428_v24 = vpop.f32.mrb[1].mxu1 }
 0x127   :  { %v167_v25 = vmax.f32 %v164_v23, 0.0 }
 0x129   :  { %438 = vmatmul.mubr.msk.f32.vlgmr.msra.gmra.mrb[2].mxu1 %vm179_vm2, %v167_v25 }
 0x1fc   :  { %v249_v30 = vpop.f32.mrb[2].mxu1 }
 0x1fd   :  { %v250_v31 = vadd.f32 %v401_v29, %v249_v30  ;;  %v439_v32 = vpop.f32.mrb[3].mxu1 }
 0x1ff   :  { %v253_v33 = vmax.f32 %v250_v31, 0.0 }
 0x201   :  { %457 = vmatmul.mubr.msk.f32.vlgmr.msra.gmra.mrb[0].mxu0 %vm269_vm3, %v253_v33 }
 0x2d4   :  { %v339_v35 = vpop.f32.mrb[0].mxu0 }
 0x2d5   :  { %v340_v36 = vadd.f32 %v403_v34, %v339_v35  ;;  %v458_v37 = vpop.f32.mrb[1].mxu0 }
 0x2d7   :  { %343 = vst [vmem:[#allocation10] sm:$0xff] %v340_v36  ;;  %352 = vrot.lane.b32.xlu0 %v340_v36, %s645_s11 }
 0x349   :  { %v353_v38 = vpop.permute.xlu0 %352 }
 0x34a   :  { %v356_v39 = vsel %vm355_vm4, %v353_v38, 0.0 }
 0x34b   :  { %357 = vadd.xlane.f32.xlu0 %v356_v39 }
 0x34c   :  { %593 = shalt.err (!%p590_p8)
}
 0x34d   :  { %s594_s17 = scalar_lea.hbm %s793_s7, 128 }
 0x34e   :  { %p595_p9 = scmp.ne.s32.totalorder %s793_s7, %s594_s17  ;;  %p598_p10 = scmp.lt.u32.totalorder %s594_s17, %s793_s7 }
 0x350   :  { %p600_p11 = pnand %p598_p10, %p595_p9 }
 0x352   :  { %603 = shalt.err (!%p600_p11)
}
 0x353   :  { %377 = dma.vmem_to_hbm [thread:$0]  %s375_s12, 128, %s793_s7, [#allocation4]  }
 0x354   :  { %s647_s24 = smov [#allocation11]  }
 0x355   :  { %s384_s25 = sshll.u32 %s647_s24, 4  ;;  %s385_s25 = int_to_ptr.vmem [resolvable:$true] %s384_s25 }
 0x356   :  { %s604_s27 = scalar_lea.vmem %s385_s25, 128  ;;  %p609_p13 = scmp.lt.s32.totalorder %s385_s25, %s385_s25 }
 0x357   :  { %p605_p12 = scmp.ne.s32.totalorder %s385_s25, %s604_s27  ;;  %p610_p0 = scmp.lt.s32.totalorder %s604_s27, %s604_s27 }
 0x359   :  { %p611_p1 = por %p610_p0, %p609_p13 }
 0x35b   :  { %p612_p2 = pnand %p611_p1, %p605_p12 }
 0x3d8   :  { %v358_v40 = vpop.xlane.xlu0 %357 }
 0x3d9   :  { %v359_v41 = vrot.slane %v358_v40, 4 }
 0x3db   :  { %v360_v42 = vadd.f32 %v359_v41, %v358_v40 }
 0x3dd   :  { %v361_v43 = vrot.slane %v360_v42, 2 }
 0x3df   :  { %v362_v44 = vadd.f32 %v361_v43, %v360_v42 }
 0x3e1   :  { %v363_v45 = vrot.slane %v362_v44, 1 }
 0x3e3   :  { %v364_v46 = vadd.f32 %v363_v45, %v362_v44 }
 0x3e5   :  { %480 = vpush %v364_v46 }
 0x416   :  { %s481_s26 = spop %480 }
 0x417   :  { %v366_v47 = vstv %s481_s26 }
 0x418   :  { %367 = vst [vmem:[#allocation11] sm:$0xff] %v366_v47 }
 0x419   :  { %615 = shalt.err (!%p612_p2)
}
 0x41a   :  { %s616_s30 = scalar_lea.hbm %s794_s8, 128 }
 0x41b   :  { %p617_p3 = scmp.ne.s32.totalorder %s794_s8, %s616_s30  ;;  %p620_p4 = scmp.lt.u32.totalorder %s616_s30, %s794_s8 }
 0x41d   :  { %p622_p5 = pnand %p620_p4, %p617_p3 }
 0x41f   :  { %625 = shalt.err (!%p622_p5)
}
 0x420   :  { %387 = dma.vmem_to_hbm [thread:$0]  %s385_s25, 128, %s794_s8, [#allocation12]  }
 0x421   :  { %632 = dma.done.wait [#allocation4], 128  }
 0x422   :  { %633 = vsyncadd [#allocation4], 4294967168 }
 0x423   :  { %634 = dma.done.wait [#allocation12], 128  }
 0x424   :  { %635 = vsyncadd [#allocation12], 4294967168 }
 0x425   :  { %394 = vsyncpa [#allocation3], 1 }
 0x426   :  { %395 = vsyncpa [#allocation6], 1 }
 0x427   :  { %396 = vsyncpa [#allocation9], 1 }
 0x428   :  { %397 = vsyncpa [#allocation4], 1 }
 0x429   :  { %398 = vsyncpa [#allocation12], 1 }

</bundles_post_ra>
